<compile_context>
chip_gen: v5e
topology: v5e:2x2
jax: 0.10.0
libtpu: 0.0.40
codegen_flags: <defaults>
</compile_context>

<pallas_src>
import jax
import jax.numpy as jnp
from jax.experimental import pallas as pl
from jax.experimental.pallas import tpu as pltpu


def _silu(v):
    # SiLU with the sigmoid expressed through tanh so it stays on the EUP
    # slot (the RBF exp already uses it; a VPU divide chain would contend
    # with the elementwise filter multiply / bias adds).
    return v * (0.5 * jnp.tanh(0.5 * v) + 0.5)


def _has_bf16_eltwise():
    # bf16 VPU/EUP exists on v6e / v7x, not on v5e or older.  Unknown
    # backends fall back to the (always-correct) f32 elementwise path.
    try:
        kind = jax.devices()[0].device_kind.lower()
    except Exception:
        return False
    if "tpu" not in kind:
        return False
    return not any(t in kind for t in ("v2", "v3", "v4", "v5"))


def _make_cfconv_kernel(bf16_math):
    edt = jnp.bfloat16 if bf16_math else jnp.float32  # elementwise/EUP dtype

    def kernel(h_ref, xs_ref, mu_ref, sel_ref, w_in_ref, b_in_ref,
               w1a_ref, w1b_ref, b1_ref, w2_ref, b2_ref, o_ref):
        S = sel_ref.shape[0]

        # mlp_in: (TM, F_in) @ (F_in, S*K) + b_in.  bf16 MXU operands, f32 acc.
        hmm = jnp.dot(h_ref[...].astype(jnp.bfloat16), w_in_ref[...],
                      preferred_element_type=jnp.float32) + b_in_ref[...]

        # RBF filter.  gamma (>= 0) is folded into mu/sel in the wrapper
        # (exp(-g (x-mu)^2) == exp(-(sqrt(g) x - sqrt(g) mu)^2)) and the
        # (TM, S*K) broadcast of x is rebuilt in-register with S broadcast
        # FMAs against the segment selector instead of being streamed from
        # HBM.  d*d stays f32; the exp (EUP) and the filter multiply run in
        # bf16 on v6e/v7x.
        xb = xs_ref[:, 0:1] * sel_ref[0:1, :]
        for t in range(1, S):
            xb = xb + xs_ref[:, t:t + 1] * sel_ref[t:t + 1, :]
        d = xb - mu_ref[...]
        filt = hmm.astype(edt) * jnp.exp(-(d * d).astype(edt))

        # mlp_out layer 1 on concat([filt, x_cat], -1): one matmul for the
        # filt part (operands already bf16 when bf16_math) and S VPU
        # broadcast-FMAs for the tiny S-wide concat part (a contraction of S
        # would waste a full MXU pass).
        z = jnp.dot(filt.astype(jnp.bfloat16), w1a_ref[...],
                    preferred_element_type=jnp.float32) + b1_ref[...]
        for t in range(S):
            z = z + xs_ref[:, S + t:S + t + 1] * w1b_ref[t:t + 1, :]
        z = _silu(z.astype(edt))

        # mlp_out layer 2.
        y = jnp.dot(z.astype(jnp.bfloat16), w2_ref[...],
                    preferred_element_type=jnp.float32) + b2_ref[...]
        y = _silu(y.astype(edt))

        # TODO(synk): lane-dense (TM//4, 4*F_out) output repack skipped; the
        # cross sublane->lane reshape needs a Mosaic-lowering check on HW.
        o_ref[...] = y.astype(o_ref.dtype)

    return kernel


def _round_up(a, b):
    return (a + b - 1) // b * b


def cfconv_recurrent(h, x, params, *, tile_m=1024, bf16_math=None):
    """h: (B, N, N, F_in); x: (B, S, N, N, 1) -> (B, N, N, F_out)."""
    B, N, N2, F_in = h.shape
    assert N == N2
    assert x.shape[-1] == 1  # the flat-view refolding below relies on this
    S = x.shape[-4]
    mu = params["mu"]
    K = mu.shape[0]
    F_out = params["b2"].shape[-1]
    M = B * N * N

    if bf16_math is None:
        bf16_math = _has_bf16_eltwise()

    # Tile sizing: as large as possible (amortizes per-grid-step overhead) but
    # keep at least _MIN_STEPS grid steps so both v7x TensorCores get work and
    # input/output DMA stays overlapped with compute; harmless on 1-TC chips.
    # The last block may be ragged; Pallas masks it on store.
    _MIN_STEPS = 4
    cap = pl.cdiv(_round_up(M, 8), _MIN_STEPS)
    tile_m = _round_up(max(8, min(tile_m, cap)), 8)
    grid = (pl.cdiv(M, tile_m),)

    # --- layout plumbing (matches torch .view / .movedim exactly) ---
    h2 = h.reshape(M, F_in)  # pure view of contiguous h, no copy
    # RBF argument under the flat (B,S,N,N,K)->(B,N,N,S*K) reinterpretation:
    # output row r = b*N*N + (i*N+j) needs x.flat[b, (i*N+j)*S + t] for
    # t = 0..S-1 (each broadcast over K lanes), i.e. exactly row r of the
    # flat reshape x.reshape(M, S).
    x_rbf = x.reshape(M, S)
    # x.movedim(-4, -1).flatten(-2, -1): the concat operand.
    x_cat = jnp.moveaxis(x, -4, -1).reshape(M, S)
    # Pack both tiny per-row operands into one (M, 2S) array: one small DMA
    # per tile instead of two mostly-padded ones.
    xs = jnp.concatenate([x_rbf, x_cat], axis=-1).astype(jnp.float32)

    # Fold gamma (must be >= 0 for this module) into mu and the selector.
    sqrt_g = jnp.sqrt(params["gamma"]).astype(jnp.float32)
    # Column c of the refolded (M, S*K) layout uses mu[c % K].
    mu_row = (jnp.tile(mu, S).reshape(1, S * K) * sqrt_g).astype(jnp.float32)
    # Selector: row t is sqrt(gamma) on columns [t*K, (t+1)*K), 0 elsewhere.
    sel = jnp.repeat(jnp.eye(S, dtype=jnp.float32), K, axis=1) * sqrt_g

    # Matmul weights in bf16 (f32 accumulation); biases / tiny pieces in f32.
    w_in = params["w_in"].astype(jnp.bfloat16)                # (F_in, S*K)
    b_in = params["b_in"].reshape(1, S * K).astype(jnp.float32)
    w1a = params["w1"][: S * K].astype(jnp.bfloat16)          # (S*K, F_out)
    w1b = params["w1"][S * K:].astype(jnp.float32)            # (S,   F_out)
    b1 = params["b1"].reshape(1, F_out).astype(jnp.float32)
    w2 = params["w2"].astype(jnp.bfloat16)                    # (F_out, F_out)
    b2 = params["b2"].reshape(1, F_out).astype(jnp.float32)

    out = pl.pallas_call(
        _make_cfconv_kernel(bf16_math),
        out_shape=jax.ShapeDtypeStruct((M, F_out), h.dtype),
        grid_spec=pltpu.PrefetchScalarGridSpec(
            num_scalar_prefetch=0,
            grid=grid,
            in_specs=[
                pl.BlockSpec((tile_m, F_in), lambda i: (i, 0)),    # h rows
                pl.BlockSpec((tile_m, 2 * S), lambda i: (i, 0)),   # packed x
                pl.BlockSpec((1, S * K), lambda i: (0, 0)),        # sqrt(g)*mu
                pl.BlockSpec((S, S * K), lambda i: (0, 0)),        # selector
                pl.BlockSpec((F_in, S * K), lambda i: (0, 0)),     # w_in
                pl.BlockSpec((1, S * K), lambda i: (0, 0)),        # b_in
                pl.BlockSpec((S * K, F_out), lambda i: (0, 0)),    # w1a
                pl.BlockSpec((S, F_out), lambda i: (0, 0)),        # w1b
                pl.BlockSpec((1, F_out), lambda i: (0, 0)),        # b1
                pl.BlockSpec((F_out, F_out), lambda i: (0, 0)),    # w2
                pl.BlockSpec((1, F_out), lambda i: (0, 0)),        # b2
            ],
            out_specs=pl.BlockSpec((tile_m, F_out), lambda i: (i, 0)),
        ),
        compiler_params=pltpu.CompilerParams(
            dimension_semantics=("parallel",)),
    )(h2, xs, mu_row, sel, w_in, b_in, w1a, w1b, b1, w2, b2)

    return out.reshape(B, N, N, F_out)


def reference(h, x, params):
    """Pure-JAX transliteration of the PyTorch forward (for verification)."""
    B, N, _, F_in = h.shape
    S = x.shape[-4]
    K = params["mu"].shape[0]
    hh = h @ params["w_in"] + params["b_in"]                      # (B,N,N,S*K)
    hh = hh.reshape(B, S, N, N, K)                                # flat view
    rbf = jnp.exp(-((x - params["mu"]) ** 2) * params["gamma"])   # (B,S,N,N,K)
    xx = (hh * rbf).reshape(B, N, N, S * K)                       # flat view back
    xc = jnp.moveaxis(x, -4, -1).reshape(B, N, N, S)
    cat = jnp.concatenate([xx, xc], axis=-1)
    z = jax.nn.silu(cat @ params["w1"] + params["b1"])
    y = jax.nn.silu(z @ params["w2"] + params["b2"])
    return y


def make_params(key, F_in, F_out, S, K):
    ks = jax.random.split(key, 6)

    def lin(k, fan_in, fan_out):
        s = 1.0 / jnp.sqrt(fan_in)
        return jax.random.uniform(k, (fan_in, fan_out), jnp.float32, -s, s)

    return {
        "mu": jnp.linspace(0.0, 4.0, K, dtype=jnp.float32),
        "gamma": jnp.array(0.5, dtype=jnp.float32),
        # mlp_in: Linear(F_in, S*K)
        "w_in": lin(ks[0], F_in, S * K),
        "b_in": jax.random.uniform(ks[1], (S * K,), jnp.float32, -0.1, 0.1),
        # mlp_out: Linear(S*K + S, F_out) -> SiLU -> Linear(F_out, F_out) -> SiLU
        "w1": lin(ks[2], S * K + S, F_out),
        "b1": jax.random.uniform(ks[3], (F_out,), jnp.float32, -0.1, 0.1),
        "w2": lin(ks[4], F_out, F_out),
        "b2": jax.random.uniform(ks[5], (F_out,), jnp.float32, -0.1, 0.1),
    }


if __name__ == "__main__":
    B, N, F_in, F_out, S, K = 2, 8, 32, 32, 2, 64

    key = jax.random.PRNGKey(0)
    k_h, k_x, k_p = jax.random.split(key, 3)

    params = make_params(k_p, F_in, F_out, S, K)
    h = jax.random.normal(k_h, (B, N, N, F_in), jnp.float32)
    # x plays the role of pairwise distances: shape (B, S, N, N, 1), non-negative
    x = jax.random.uniform(k_x, (B, S, N, N, 1), jnp.float32, 0.0, 4.0)

    out = jax.block_until_ready(cfconv_recurrent(h, x, params))
    ref = jax.block_until_ready(reference(h, x, params))
    assert out.shape == (B, N, N, F_out)
    assert jnp.allclose(out, ref, atol=5e-2, rtol=5e-2), (
        float(jnp.max(jnp.abs(out - ref))))

    # Exercise the multi-tile + ragged-last-block path
    # (M = 2*10*10 = 200 rows, tile capped so the grid has >= 4 steps).
    N2 = 10
    h_b = jax.random.normal(jax.random.PRNGKey(1), (B, N2, N2, F_in), jnp.float32)
    x_b = jax.random.uniform(jax.random.PRNGKey(2), (B, S, N2, N2, 1),
                             jnp.float32, 0.0, 4.0)
    out_b = jax.block_until_ready(cfconv_recurrent(h_b, x_b, params, tile_m=64))
    ref_b = jax.block_until_ready(reference(h_b, x_b, params))
    assert jnp.allclose(out_b, ref_b, atol=5e-2, rtol=5e-2), (
        float(jnp.max(jnp.abs(out_b - ref_b))))

    # Exercise the explicit f32-elementwise path too (the v5e code path),
    # regardless of which chip we are actually on.
    out_c = jax.block_until_ready(
        cfconv_recurrent(h_b, x_b, params, tile_m=64, bf16_math=False))
    assert jnp.allclose(out_c, ref_b, atol=5e-2, rtol=5e-2), (
        float(jnp.max(jnp.abs(out_c - ref_b))))

    print("KERNEL_OK")
</pallas_src>

<mosaic_0001>
module attributes {stable_mosaic.version = 11 : i64} {
  func.func @kernel(%arg0: i32, %arg1: memref<32x32xf32, #tpu.memory_space<vmem>>, %arg2: memref<32x4xf32, #tpu.memory_space<vmem>>, %arg3: memref<1x128xf32, #tpu.memory_space<vmem>>, %arg4: memref<2x128xf32, #tpu.memory_space<vmem>>, %arg5: memref<32x128xbf16, #tpu.memory_space<vmem>>, %arg6: memref<1x128xf32, #tpu.memory_space<vmem>>, %arg7: memref<128x32xbf16, #tpu.memory_space<vmem>>, %arg8: memref<2x32xf32, #tpu.memory_space<vmem>>, %arg9: memref<1x32xf32, #tpu.memory_space<vmem>>, %arg10: memref<32x32xbf16, #tpu.memory_space<vmem>>, %arg11: memref<1x32xf32, #tpu.memory_space<vmem>>, %arg12: memref<32x32xf32, #tpu.memory_space<vmem>>) attributes {dimension_semantics = [#tpu.dimension_semantics<parallel>], iteration_bounds = array<i64: 4>, scalar_prefetch = 0 : i64, scratch_operands = 0 : i64, tpu.core_type = #tpu.core_type<tc>, window_params = [{transform_indices = @transform_0, window_bounds = array<i64: 32, 32>}, {transform_indices = @transform_1, window_bounds = array<i64: 32, 4>}, {pipeline_mode = #tpu.pipeline_mode<synchronous>, transform_indices = @transform_2, window_bounds = array<i64: 1, 128>}, {pipeline_mode = #tpu.pipeline_mode<synchronous>, transform_indices = @transform_3, window_bounds = array<i64: 2, 128>}, {pipeline_mode = #tpu.pipeline_mode<synchronous>, transform_indices = @transform_4, window_bounds = array<i64: 32, 128>}, {pipeline_mode = #tpu.pipeline_mode<synchronous>, transform_indices = @transform_5, window_bounds = array<i64: 1, 128>}, {pipeline_mode = #tpu.pipeline_mode<synchronous>, transform_indices = @transform_6, window_bounds = array<i64: 128, 32>}, {pipeline_mode = #tpu.pipeline_mode<synchronous>, transform_indices = @transform_7, window_bounds = array<i64: 2, 32>}, {pipeline_mode = #tpu.pipeline_mode<synchronous>, transform_indices = @transform_8, window_bounds = array<i64: 1, 32>}, {pipeline_mode = #tpu.pipeline_mode<synchronous>, transform_indices = @transform_9, window_bounds = array<i64: 32, 32>}, {pipeline_mode = #tpu.pipeline_mode<synchronous>, transform_indices = @transform_10, window_bounds = array<i64: 1, 32>}, {transform_indices = @transform_11, window_bounds = array<i64: 32, 32>}]} {
    %c0 = arith.constant 0 : index
    %c0_0 = arith.constant 0 : index
    %0 = vector.load %arg1[%c0, %c0_0] : memref<32x32xf32, #tpu.memory_space<vmem>>, vector<32x32xf32>
    %1 = arith.truncf %0 : vector<32x32xf32> to vector<32x32xbf16>
    %c0_1 = arith.constant 0 : index
    %c0_2 = arith.constant 0 : index
    %2 = vector.load %arg5[%c0_1, %c0_2] : memref<32x128xbf16, #tpu.memory_space<vmem>>, vector<32x128xbf16>
    %cst = arith.constant dense<0.000000e+00> : vector<32x128xf32>
    %3 = tpu.matmul %1, %2, %cst {dimension_numbers = #tpu.dot_dimension_numbers<[1], [0], [0], [1], [0, 0, 1, 1], [], []>} : vector<32x32xbf16>, vector<32x128xbf16>, vector<32x128xf32> -> vector<32x128xf32>
    %c0_3 = arith.constant 0 : index
    %c0_4 = arith.constant 0 : index
    %4 = vector.load %arg6[%c0_3, %c0_4] : memref<1x128xf32, #tpu.memory_space<vmem>>, vector<1x128xf32>
    %5 = vector.broadcast %4 : vector<1x128xf32> to vector<32x128xf32>
    %6 = arith.addf %3, %5 : vector<32x128xf32>
    %c0_5 = arith.constant 0 : index
    %c0_6 = arith.constant 0 : index
    %7 = vector.load %arg2[%c0_5, %c0_6] : memref<32x4xf32, #tpu.memory_space<vmem>>, vector<32x1xf32>
    %c0_7 = arith.constant 0 : index
    %c0_8 = arith.constant 0 : index
    %8 = vector.load %arg4[%c0_7, %c0_8] : memref<2x128xf32, #tpu.memory_space<vmem>>, vector<1x128xf32>
    %9 = vector.broadcast %7 : vector<32x1xf32> to vector<32x128xf32>
    %10 = vector.broadcast %8 : vector<1x128xf32> to vector<32x128xf32>
    %11 = arith.mulf %9, %10 : vector<32x128xf32>
    %c0_9 = arith.constant 0 : index
    %c1 = arith.constant 1 : index
    %12 = vector.load %arg2[%c0_9, %c1] : memref<32x4xf32, #tpu.memory_space<vmem>>, vector<32x1xf32>
    %c1_10 = arith.constant 1 : index
    %c0_11 = arith.constant 0 : index
    %13 = vector.load %arg4[%c1_10, %c0_11] : memref<2x128xf32, #tpu.memory_space<vmem>>, vector<1x128xf32>
    %14 = vector.broadcast %12 : vector<32x1xf32> to vector<32x128xf32>
    %15 = vector.broadcast %13 : vector<1x128xf32> to vector<32x128xf32>
    %16 = arith.mulf %14, %15 : vector<32x128xf32>
    %17 = arith.addf %11, %16 : vector<32x128xf32>
    %c0_12 = arith.constant 0 : index
    %c0_13 = arith.constant 0 : index
    %18 = vector.load %arg3[%c0_12, %c0_13] : memref<1x128xf32, #tpu.memory_space<vmem>>, vector<1x128xf32>
    %19 = vector.broadcast %18 : vector<1x128xf32> to vector<32x128xf32>
    %20 = arith.subf %17, %19 : vector<32x128xf32>
    %21 = arith.mulf %20, %20 : vector<32x128xf32>
    %cst_14 = arith.constant 0.000000e+00 : f32
    %22 = vector.broadcast %cst_14 : f32 to vector<32x128xf32>
    %23 = arith.subf %22, %21 : vector<32x128xf32>
    %24 = math.exp %23 : vector<32x128xf32>
    %25 = arith.mulf %6, %24 : vector<32x128xf32>
    %26 = arith.truncf %25 : vector<32x128xf32> to vector<32x128xbf16>
    %c0_15 = arith.constant 0 : index
    %c0_16 = arith.constant 0 : index
    %27 = vector.load %arg7[%c0_15, %c0_16] : memref<128x32xbf16, #tpu.memory_space<vmem>>, vector<128x32xbf16>
    %cst_17 = arith.constant dense<0.000000e+00> : vector<32x32xf32>
    %28 = tpu.matmul %26, %27, %cst_17 {dimension_numbers = #tpu.dot_dimension_numbers<[1], [0], [0], [1], [0, 0, 1, 1], [], []>} : vector<32x128xbf16>, vector<128x32xbf16>, vector<32x32xf32> -> vector<32x32xf32>
    %c0_18 = arith.constant 0 : index
    %c0_19 = arith.constant 0 : index
    %29 = vector.load %arg9[%c0_18, %c0_19] : memref<1x32xf32, #tpu.memory_space<vmem>>, vector<1x32xf32>
    %30 = vector.broadcast %29 : vector<1x32xf32> to vector<32x32xf32>
    %31 = arith.addf %28, %30 : vector<32x32xf32>
    %c0_20 = arith.constant 0 : index
    %c2 = arith.constant 2 : index
    %32 = vector.load %arg2[%c0_20, %c2] : memref<32x4xf32, #tpu.memory_space<vmem>>, vector<32x1xf32>
    %c0_21 = arith.constant 0 : index
    %c0_22 = arith.constant 0 : index
    %33 = vector.load %arg8[%c0_21, %c0_22] : memref<2x32xf32, #tpu.memory_space<vmem>>, vector<1x32xf32>
    %34 = vector.broadcast %32 : vector<32x1xf32> to vector<32x32xf32>
    %35 = vector.broadcast %33 : vector<1x32xf32> to vector<32x32xf32>
    %36 = arith.mulf %34, %35 : vector<32x32xf32>
    %37 = arith.addf %31, %36 : vector<32x32xf32>
    %c0_23 = arith.constant 0 : index
    %c3 = arith.constant 3 : index
    %38 = vector.load %arg2[%c0_23, %c3] : memref<32x4xf32, #tpu.memory_space<vmem>>, vector<32x1xf32>
    %c1_24 = arith.constant 1 : index
    %c0_25 = arith.constant 0 : index
    %39 = vector.load %arg8[%c1_24, %c0_25] : memref<2x32xf32, #tpu.memory_space<vmem>>, vector<1x32xf32>
    %40 = vector.broadcast %38 : vector<32x1xf32> to vector<32x32xf32>
    %41 = vector.broadcast %39 : vector<1x32xf32> to vector<32x32xf32>
    %42 = arith.mulf %40, %41 : vector<32x32xf32>
    %43 = arith.addf %37, %42 : vector<32x32xf32>
    %cst_26 = arith.constant 5.000000e-01 : f32
    %44 = vector.broadcast %cst_26 : f32 to vector<32x32xf32>
    %45 = arith.mulf %44, %43 : vector<32x32xf32>
    %46 = math.tanh %45 : vector<32x32xf32>
    %cst_27 = arith.constant 5.000000e-01 : f32
    %47 = vector.broadcast %cst_27 : f32 to vector<32x32xf32>
    %48 = arith.mulf %47, %46 : vector<32x32xf32>
    %cst_28 = arith.constant 5.000000e-01 : f32
    %49 = vector.broadcast %cst_28 : f32 to vector<32x32xf32>
    %50 = arith.addf %48, %49 : vector<32x32xf32>
    %51 = arith.mulf %43, %50 : vector<32x32xf32>
    %52 = arith.truncf %51 : vector<32x32xf32> to vector<32x32xbf16>
    %c0_29 = arith.constant 0 : index
    %c0_30 = arith.constant 0 : index
    %53 = vector.load %arg10[%c0_29, %c0_30] : memref<32x32xbf16, #tpu.memory_space<vmem>>, vector<32x32xbf16>
    %cst_31 = arith.constant dense<0.000000e+00> : vector<32x32xf32>
    %54 = tpu.matmul %52, %53, %cst_31 {dimension_numbers = #tpu.dot_dimension_numbers<[1], [0], [0], [1], [0, 0, 1, 1], [], []>} : vector<32x32xbf16>, vector<32x32xbf16>, vector<32x32xf32> -> vector<32x32xf32>
    %c0_32 = arith.constant 0 : index
    %c0_33 = arith.constant 0 : index
    %55 = vector.load %arg11[%c0_32, %c0_33] : memref<1x32xf32, #tpu.memory_space<vmem>>, vector<1x32xf32>
    %56 = vector.broadcast %55 : vector<1x32xf32> to vector<32x32xf32>
    %57 = arith.addf %54, %56 : vector<32x32xf32>
    %cst_34 = arith.constant 5.000000e-01 : f32
    %58 = vector.broadcast %cst_34 : f32 to vector<32x32xf32>
    %59 = arith.mulf %58, %57 : vector<32x32xf32>
    %60 = math.tanh %59 : vector<32x32xf32>
    %cst_35 = arith.constant 5.000000e-01 : f32
    %61 = vector.broadcast %cst_35 : f32 to vector<32x32xf32>
    %62 = arith.mulf %61, %60 : vector<32x32xf32>
    %cst_36 = arith.constant 5.000000e-01 : f32
    %63 = vector.broadcast %cst_36 : f32 to vector<32x32xf32>
    %64 = arith.addf %62, %63 : vector<32x32xf32>
    %65 = arith.mulf %57, %64 : vector<32x32xf32>
    %c0_37 = arith.constant 0 : index
    %c0_38 = arith.constant 0 : index
    %66 = vector.load %arg12[%c0_37, %c0_38] : memref<32x32xf32, #tpu.memory_space<vmem>>, vector<32x32xf32>
    tpu.vector_store %arg12[%c0_37, %c0_38], %65 {strides = array<i32>} : memref<32x32xf32, #tpu.memory_space<vmem>>, vector<32x32xf32>,
    return
  }
  func.func @transform_0(%arg0: i32) -> (i32, i32) {
    %c0_i32 = arith.constant 0 : i32
    %c0_i32_0 = arith.constant 0 : i32
    return %arg0, %c0_i32 : i32, i32
  }
  func.func @transform_1(%arg0: i32) -> (i32, i32) {
    %c0_i32 = arith.constant 0 : i32
    %c0_i32_0 = arith.constant 0 : i32
    return %arg0, %c0_i32 : i32, i32
  }
  func.func @transform_2(%arg0: i32) -> (i32, i32) {
    %c0_i32 = arith.constant 0 : i32
    %c0_i32_0 = arith.constant 0 : i32
    %c0_i32_1 = arith.constant 0 : i32
    return %c0_i32, %c0_i32_0 : i32, i32
  }
  func.func @transform_3(%arg0: i32) -> (i32, i32) {
    %c0_i32 = arith.constant 0 : i32
    %c0_i32_0 = arith.constant 0 : i32
    %c0_i32_1 = arith.constant 0 : i32
    return %c0_i32, %c0_i32_0 : i32, i32
  }
  func.func @transform_4(%arg0: i32) -> (i32, i32) {
    %c0_i32 = arith.constant 0 : i32
    %c0_i32_0 = arith.constant 0 : i32
    %c0_i32_1 = arith.constant 0 : i32
    return %c0_i32, %c0_i32_0 : i32, i32
  }
  func.func @transform_5(%arg0: i32) -> (i32, i32) {
    %c0_i32 = arith.constant 0 : i32
    %c0_i32_0 = arith.constant 0 : i32
    %c0_i32_1 = arith.constant 0 : i32
    return %c0_i32, %c0_i32_0 : i32, i32
  }
  func.func @transform_6(%arg0: i32) -> (i32, i32) {
    %c0_i32 = arith.constant 0 : i32
    %c0_i32_0 = arith.constant 0 : i32
    %c0_i32_1 = arith.constant 0 : i32
    return %c0_i32, %c0_i32_0 : i32, i32
  }
  func.func @transform_7(%arg0: i32) -> (i32, i32) {
    %c0_i32 = arith.constant 0 : i32
    %c0_i32_0 = arith.constant 0 : i32
    %c0_i32_1 = arith.constant 0 : i32
    return %c0_i32, %c0_i32_0 : i32, i32
  }
  func.func @transform_8(%arg0: i32) -> (i32, i32) {
    %c0_i32 = arith.constant 0 : i32
    %c0_i32_0 = arith.constant 0 : i32
    %c0_i32_1 = arith.constant 0 : i32
    return %c0_i32, %c0_i32_0 : i32, i32
  }
  func.func @transform_9(%arg0: i32) -> (i32, i32) {
    %c0_i32 = arith.constant 0 : i32
    %c0_i32_0 = arith.constant 0 : i32
    %c0_i32_1 = arith.constant 0 : i32
    return %c0_i32, %c0_i32_0 : i32, i32
  }
  func.func @transform_10(%arg0: i32) -> (i32, i32) {
    %c0_i32 = arith.constant 0 : i32
    %c0_i32_0 = arith.constant 0 : i32
    %c0_i32_1 = arith.constant 0 : i32
    return %c0_i32, %c0_i32_0 : i32, i32
  }
  func.func @transform_11(%arg0: i32) -> (i32, i32) {
    %c0_i32 = arith.constant 0 : i32
    %c0_i32_0 = arith.constant 0 : i32
    return %arg0, %c0_i32 : i32, i32
  }
}

</mosaic_0001>

<bundles_post_ra>
// kernel: tpu_custom_call.1
= control target key start
LH: loop header
LB: loop body
LE: loop exit
PB: predicated region body
PF: predicated region fallthrough
CT: control target
= control target key end

     0   :  { %s1061_s17 = smov 0   ;;  %s1172_s0 = inlined_call_operand.vmem [shape: f32[128,32], index: 0, kind: input, shape index: {}]   ;;  %s1173_s1 = inlined_call_operand.vmem [shape: f32[128,4], index: 1, kind: input, shape index: {}]   ;;  %s1174_s2 = inlined_call_operand.vmem [shape: f32[1,128], index: 2, kind: input, shape index: {}]   ;;  %s1175_s3 = inlined_call_operand.vmem [shape: f32[2,128], index: 3, kind: input, shape index: {}]   ;;  %s1176_s4 = inlined_call_operand.vmem [shape: bf16[32,128], index: 4, kind: input, shape index: {}]   ;;  %s1177_s5 = inlined_call_operand.vmem [shape: f32[1,128], index: 5, kind: input, shape index: {}]   ;;  %s1178_s6 = inlined_call_operand.vmem [shape: bf16[128,32], index: 6, kind: input, shape index: {}]   ;;  %s1179_s7 = inlined_call_operand.vmem [shape: f32[2,32], index: 7, kind: input, shape index: {}]   ;;  %s1180_s8 = inlined_call_operand.vmem [shape: f32[1,32], index: 8, kind: input, shape index: {}]   ;;  %s1181_s9 = inlined_call_operand.vmem [shape: bf16[32,32], index: 9, kind: input, shape index: {}]   ;;  %s1182_s10 = inlined_call_operand.vmem [shape: f32[1,32], index: 10, kind: input, shape index: {}]   ;;  %s1183_s11 = inlined_call_operand.vmem [shape: f32[128,32], index: 11, kind: output, shape index: {}]  }
   0x1 LB: > { %s849_s18 = sadd.s32 4294967295, %s995_s17   ;;  %p853_p0 = scmp.ge.s32.totalorder %s995_s17, 1  ;;  %s995_s17 = sphi %s1061_s17, %s21_s17  }
   0x2   : > { %p349_p1 = scmp.lt.s32.totalorder %s995_s17, 5 }
   0x4   : > { %p350_p2 = pnand %p853_p0, %p349_p1 }
   0x5   : > { %s854_s21 = sshll.u32 (!%p350_p2), %s849_s18, 2 }
   0x6   : > { %353 = sbr.rel (%p350_p2) target bundleno = 497 (0x1f1), region = 64  ;;  %p395_p3 = scmp.lt.s32.totalorder (!%p350_p2), %s854_s21, 15 }
   0xb   : > { %v915_v0 = vld [vmem:[%s1176_s4 + $0x8] sm:$0xff]  ;;  %v997_v1 = vmov 1   ;;  %v998_v2 = vmov 0   ;;  %v914_v3 = vld [vmem:[%s1176_s4] sm:$0xff]  ;;  %s1185_s21 = smov (!%p395_p3, %s854_s21), 15  ;;  %vm439_vm0 = vcmask 261120  }
   0xc   : > { %947 = vset.pattern.permute.xlu1 %v997_v1  ;;  %946 = vset.pattern.permute.xlu0 %v998_v2  ;;  %s1075_s24 = sshll.u32 %s1185_s21, 3  ;;  %v923_v14 = vld [vmem:[%s1178_s6 + $0x38] sm:$0xff]  ;;  %v922_v15 = vld [vmem:[%s1178_s6 + $0x30] sm:$0xff]  ;;  %v921_v16 = vld [vmem:[%s1178_s6 + $0x28] sm:$0xff]  ;;  %v999_v37 = vmov 2   ;;  %v1000_v42 = vmov 3  }
   0xd   : > { %452 = vmatpush.bf16.msra.mxu0 %v915_v0  ;;  %948 = vset.pattern.permute.xlu2 %v998_v2  ;;  %s404_s27 = scalar_lea.vmem %s1173_s1, %s1075_s24  ;;  %s398_s30 = scalar_lea.vmem %s1172_s0, %s1075_s24  ;;  %v920_v17 = vld [vmem:[%s1178_s6 + $0x20] sm:$0xff]  ;;  %v919_v18 = vld [vmem:[%s1178_s6 + $0x18] sm:$0xff]  ;;  %v918_v19 = vld [vmem:[%s1178_s6 + $0x10] sm:$0xff] }
   0xe   : > { %v1085_v4 = vld [vmem:[%s404_s27] sm:$0xff]  ;;  %v414_v6 = vld [vmem:[%s398_s30 + $0x8] sm:$0xff]  ;;  %v1089_v8 = vld [vmem:[%s404_s27 + $0x10] sm:$0xff]  ;;  %619 = vmatpush.bf16.msra.mxu1 %v923_v14  ;;  %926 = vmatpush.bf16.msra.mxu3 %v923_v14  ;;  %s410_s16 = scalar_lea.vmem %s1183_s11, %s1075_s24 }
   0xf   : > { %v413_v5 = vld [vmem:[%s398_s30] sm:$0xff]  ;;  %497 = vperm.xlu1 %947, %v1085_v4   ;;  %472 = vperm.xlu0 %946, %v1085_v4   ;;  %v466_v9 = vld [vmem:[%s404_s27 + $0x8] sm:$0xff]  ;;  %v1093_v10 = vld [vmem:[%s404_s27 + $0x18] sm:$0xff] }
  0x10   : > { %v417_v7 = vpack.c.bf16 %v414_v6, %v413_v5  ;;  %482 = vperm.xlu2 %948, %v1089_v8   ;;  %v415_v11 = vld [vmem:[%s398_s30 + $0x10] sm:$0xff]  ;;  %v416_v12 = vld [vmem:[%s398_s30 + $0x18] sm:$0xff]  ;;  %v917_v20 = vld [vmem:[%s1178_s6 + $0x8] sm:$0xff] }
  0x11   : > { %453 = vmatpush.bf16.msra.mxu0 %v914_v3  ;;  %v418_v13 = vpack.c.bf16 %v416_v12, %v415_v11  ;;  %v916_v21 = vld [vmem:[%s1178_s6] sm:$0xff] }
  0x12   : > { %620 = vmatpush.bf16.msra.mxu1 %v922_v15  ;;  %927 = vmatpush.bf16.msra.mxu3 %v922_v15  ;;  %v957_v22 = vld [vmem:[%s1175_s3 + $0x1] ss:$0 sm:$0xff]  ;;  %v958_v23 = vld [vmem:[%s1175_s3] ss:$0 sm:$0xff] }
  0x13   : > { %v959_v27 = vld [vmem:[%s1174_s2] ss:$0 sm:$0xff] }
  0x14   : > { %868 = vmatmul.msk.bf16.vlgmr.msra.gmra.mxu0 %vm439_vm0, %v417_v7  ;;  %v960_v58 = vld [vmem:[%s1177_s5] ss:$0 sm:$0xff] }
  0x16   : > { %621 = vmatpush.bf16.msra.mxu1 %v921_v16  ;;  %928 = vmatpush.bf16.msra.mxu3 %v921_v16 }
  0x17   : > { %501 = vperm.xlu1 %947, %v466_v9   ;;  %477 = vperm.xlu0 %946, %v466_v9  }
  0x18   : > { %487 = vperm.xlu2 %948, %v1093_v10  }
  0x1a   : > { %622 = vmatpush.bf16.msra.mxu1 %v920_v17  ;;  %929 = vmatpush.bf16.msra.mxu3 %v920_v17 }
  0x1e   : > { %623 = vmatpush.bf16.msra.mxu1 %v919_v18  ;;  %930 = vmatpush.bf16.msra.mxu3 %v919_v18 }
  0x1f   : > { %509 = vperm.xlu1 %947, %v1093_v10   ;;  %949 = vset.pattern.permute.xlu0 %v997_v1 }
  0x20   : > { %505 = vperm.xlu0 %949, %v1089_v8   ;;  %950 = vset.pattern.permute.xlu2 %v999_v37 }
  0x21   : > { %640 = vperm.xlu2 %950, %v1085_v4  }
  0x22   : > { %624 = vmatpush.bf16.msra.mxu1 %v918_v19  ;;  %931 = vmatpush.bf16.msra.mxu3 %v918_v19 }
  0x24   : > { %869 = vmatmul.msk.bf16.gmra.mxu0 %vm439_vm0, %v418_v13 }
  0x26   : > { %625 = vmatpush.bf16.msra.mxu1 %v917_v20  ;;  %932 = vmatpush.bf16.msra.mxu3 %v917_v20  ;;  %v925_v20 = vld [vmem:[%s1181_s9 + $0x8] sm:$0xff] }
  0x27   : > { %951 = vset.pattern.permute.xlu1 %v999_v37  ;;  %744 = vmatpush.bf16.msra.mxu2 %v925_v20 }
  0x28   : > { %644 = vperm.xlu1 %951, %v466_v9   ;;  %953 = vset.pattern.permute.xlu0 %v1000_v42 }
  0x29   : > { %670 = vperm.xlu0 %953, %v466_v9   ;;  %952 = vset.pattern.permute.xlu2 %v1000_v42 }
  0x2a   : > { %626 = vmatpush.bf16.msra.mxu1 %v916_v21  ;;  %933 = vmatpush.bf16.msra.mxu3 %v916_v21  ;;  %v961_v21 = vld [vmem:[%s1179_s7] ss:$0 sm:$0xff] }
  0x2b   : > { %666 = vperm.xlu2 %952, %v1085_v4  }
  0x30   : > { %648 = vperm.xlu1 %951, %v1089_v8  }
  0x33   : > { %954 = vset.pattern.permute.xlu2 %v999_v37 }
  0x34   : > { %652 = vperm.xlu2 %954, %v1093_v10  }
  0x38   : > { %955 = vset.pattern.permute.xlu1 %v1000_v42 }
  0x39   : > { %674 = vperm.xlu1 %955, %v1089_v8  }
  0x3c   : > { %956 = vset.pattern.permute.xlu2 %v1000_v42 }
  0x3d   : > { %678 = vperm.xlu2 %956, %v1093_v10   ;;  %v924_v10 = vld [vmem:[%s1181_s9] sm:$0xff] }
  0x3e   : > { %745 = vmatpush.bf16.msra.mxu2 %v924_v10 }
  0x6a   : > { %v483_v30 = vpop.permute.xlu2 %482 }
  0x6b   : > { %v493_v51 = vmul.f32 %v958_v23, %v483_v30 }
  0x72   : > { %v488_v43 = vpop.permute.xlu2 %487 }
  0x73   : > { %v494_v48 = vmul.f32 %v958_v23, %v488_v43 }
  0x7b   : > { %v641_v19 = vpop.permute.xlu2 %640 }
  0x81   : > { %v498_v24 = vpop.permute.xlu1 %497  ;;  %v473_v25 = vpop.permute.xlu0 %472 }
  0x82   : > { %v513_v26 = vmul.f32 %v957_v22, %v498_v24  ;;  %v491_v28 = vmul.f32 %v958_v23, %v473_v25 }
  0x84   : > { %v517_v29 = vadd.f32 %v513_v26, %v491_v28  ;;  %v656_v26 = vmul.f32 %v961_v21, %v641_v19 }
  0x85   : > { %v667_v24 = vpop.permute.xlu2 %666 }
  0x86   : > { %v525_v31 = vsub.f32 %v517_v29, %v959_v27 }
  0x88   : > { %v529_v32 = vmul.f32 %v525_v31, %v525_v31 }
  0x89   : > { %v502_v33 = vpop.permute.xlu1 %501  ;;  %v478_v34 = vpop.permute.xlu0 %477 }
  0x8a   : > { %v514_v35 = vmul.f32 %v957_v22, %v502_v33  ;;  %v492_v36 = vmul.f32 %v958_v23, %v478_v34  ;;  %v533_v38 = vsub.f32 0.0, %v529_v32  ;;  %v963_v23 = vld [vmem:[%s1179_s7 + $0x1] ss:$0 sm:$0xff] }
  0x8b   : > { %v682_v29 = vmul.f32 %v963_v23, %v667_v24 }
  0x8c   : > { %v518_v39 = vadd.f32 %v514_v35, %v492_v36  ;;  %v537_v44 = vmul.f32 1.442695, %v533_v38 }
  0x8e   : > { %v526_v40 = vsub.f32 %v518_v39, %v959_v27  ;;  %965 = vpow2.f32 %v537_v44 }
  0x90   : > { %v530_v45 = vmul.f32 %v526_v40, %v526_v40 }
  0x91   : > { %v455_v41 = vpop.f32.mrf.mxu0  ;;  %v510_v46 = vpop.permute.xlu1 %509 }
  0x92   : > { %v534_v47 = vsub.f32 0.0, %v530_v45  ;;  %v516_v49 = vmul.f32 %v957_v22, %v510_v46  ;;  %v506_v50 = vpop.permute.xlu0 %505  ;;  %v456_v0 = vadd.f32 %v960_v58, %v455_v41  ;;  %v653_v41 = vpop.permute.xlu2 %652 }
  0x93   : > { %v515_v52 = vmul.f32 %v957_v22, %v506_v50  ;;  %v962_v22 = vld [vmem:[%s1180_s8] ss:$0 sm:$0xff] }
  0x94   : > { %v539_v53 = vmul.f32 1.442695, %v534_v47  ;;  %v520_v54 = vadd.f32 %v516_v49, %v494_v48  ;;  %v966_v62 = vpop.eup %965 }
  0x95   : > { %v519_v55 = vadd.f32 %v515_v52, %v493_v51  ;;  %v545_v4 = vmul.f32 %v966_v62, %v456_v0 }
  0x96   : > { %967 = vpow2.f32 %v539_v53  ;;  %v528_v56 = vsub.f32 %v520_v54, %v959_v27 }
  0x97   : > { %v527_v59 = vsub.f32 %v519_v55, %v959_v27 }
  0x98   : > { %v532_v60 = vmul.f32 %v528_v56, %v528_v56 }
  0x99   : > { %v457_v57 = vpop.f32.mrf.mxu0  ;;  %v531_v61 = vmul.f32 %v527_v59, %v527_v59  ;;  %v659_v59 = vmul.f32 %v961_v21, %v653_v41 }
  0x9a   : > { %v536_v63 = vsub.f32 0.0, %v532_v60  ;;  %v458_v2 = vadd.f32 %v960_v58, %v457_v57  ;;  %v645_v25 = vpop.permute.xlu1 %644  ;;  %v679_v55 = vpop.permute.xlu2 %678 }
  0x9b   : > { %v535_v1 = vsub.f32 0.0, %v531_v61  ;;  %v671_v32 = vpop.permute.xlu0 %670  ;;  %v657_v34 = vmul.f32 %v961_v21, %v645_v25  ;;  %v685_v61 = vmul.f32 %v963_v23, %v679_v55 }
  0x9c   : > { %v968_v3 = vpop.eup %967  ;;  %v543_v7 = vmul.f32 1.442695, %v536_v63  ;;  %v683_v38 = vmul.f32 %v963_v23, %v671_v32 }
  0x9d   : > { %v541_v5 = vmul.f32 1.442695, %v535_v1  ;;  %v546_v6 = vmul.f32 %v968_v3, %v458_v2 }
  0x9f   : > { %v549_v11 = vpack.c.bf16 %v546_v6, %v545_v4  ;;  %969 = vpow2.f32 %v541_v5 }
  0xa0   : > { %971 = vpow2.f32 %v543_v7 }
  0xa1   : > { %v460_v9 = vpop.f32.mrf.mxu0  ;;  %627 = vmatmul.bf16.vlgmr.msra.gmra.mxu1 %v549_v11 }
  0xa2   : > { %v461_v14 = vadd.f32 %v960_v58, %v460_v9  ;;  %v649_v36 = vpop.permute.xlu1 %648 }
  0xa3   : > { %v658_v46 = vmul.f32 %v961_v21, %v649_v36 }
  0xa5   : > { %v970_v12 = vpop.eup %969 }
  0xa6   : > { %v972_v8 = vpop.eup %971  ;;  %v547_v16 = vmul.f32 %v970_v12, %v461_v14 }
  0xa9   : > { %v462_v13 = vpop.f32.mrf.mxu0 }
  0xaa   : > { %v463_v15 = vadd.f32 %v960_v58, %v462_v13 }
  0xab   : > { %v675_v43 = vpop.permute.xlu1 %674 }
  0xac   : > { %v548_v17 = vmul.f32 %v972_v8, %v463_v15  ;;  %v684_v48 = vmul.f32 %v963_v23, %v675_v43  ;;  %v964_v15 = vld [vmem:[%s1182_s10] ss:$0 sm:$0xff] }
  0xae   : > { %v550_v18 = vpack.c.bf16 %v548_v17, %v547_v16 }
  0xb0   : > { %632 = vmatmul.bf16.vlgmr.msra.gmra.mxu3 %v550_v18 }
 0x11e   : > { %v628_v27 = vpop.f32.mrf.mxu1 }
 0x11f   : > { %v629_v28 = vadd.f32 %v962_v22, %v628_v27 }
 0x121   : > { %v660_v30 = vadd.f32 %v656_v26, %v629_v28 }
 0x123   : > { %v686_v31 = vadd.f32 %v682_v29, %v660_v30 }
 0x125   : > { %v690_v33 = vmul.f32 0.5, %v686_v31 }
 0x126   : > { %v630_v35 = vpop.f32.mrf.mxu1 }
 0x127   : > { %v631_v37 = vadd.f32 %v962_v22, %v630_v35  ;;  %973 = vtanh.f32 %v690_v33 }
 0x129   : > { %v661_v39 = vadd.f32 %v657_v34, %v631_v37 }
 0x12b   : > { %v687_v40 = vadd.f32 %v683_v38, %v661_v39 }
 0x12d   : > { %v691_v42 = vmul.f32 0.5, %v687_v40  ;;  %v974_v44 = vpop.eup %973 }
 0x12e   : > { %v698_v49 = vmul.f32 0.5, %v974_v44 }
 0x12f   : > { %975 = vtanh.f32 %v691_v42 }
 0x130   : > { %v702_v53 = vadd.f32 0.5, %v698_v49 }
 0x132   : > { %v706_v62 = vmul.f32 %v702_v53, %v686_v31 }
 0x133   : > { %v633_v45 = vpop.f32.mrf.mxu3 }
 0x134   : > { %v634_v47 = vadd.f32 %v962_v22, %v633_v45 }
 0x135   : > { %v976_v51 = vpop.eup %975 }
 0x136   : > { %v662_v50 = vadd.f32 %v658_v46, %v634_v47  ;;  %v699_v54 = vmul.f32 0.5, %v976_v51 }
 0x138   : > { %v688_v52 = vadd.f32 %v684_v48, %v662_v50  ;;  %v703_v57 = vadd.f32 0.5, %v699_v54 }
 0x13a   : > { %v692_v56 = vmul.f32 0.5, %v688_v52  ;;  %v707_v63 = vmul.f32 %v703_v57, %v687_v40 }
 0x13b   : > { %v635_v58 = vpop.f32.mrf.mxu3 }
 0x13c   : > { %v636_v60 = vadd.f32 %v962_v22, %v635_v58  ;;  %977 = vtanh.f32 %v692_v56  ;;  %v710_v1 = vpack.c.bf16 %v707_v63, %v706_v62 }
 0x13e   : > { %v663_v0 = vadd.f32 %v659_v59, %v636_v60  ;;  %910 = vmatmul.msk.bf16.vlgmr.msra.gmra.mxu2 %vm439_vm0, %v710_v1 }
 0x140   : > { %v689_v2 = vadd.f32 %v685_v61, %v663_v0 }
 0x142   : > { %v693_v3 = vmul.f32 0.5, %v689_v2  ;;  %v978_v4 = vpop.eup %977 }
 0x143   : > { %v700_v5 = vmul.f32 0.5, %v978_v4 }
 0x144   : > { %979 = vtanh.f32 %v693_v3 }
 0x145   : > { %v704_v7 = vadd.f32 0.5, %v700_v5 }
 0x147   : > { %v708_v12 = vmul.f32 %v704_v7, %v688_v52 }
 0x14a   : > { %v980_v6 = vpop.eup %979 }
 0x14b   : > { %v701_v9 = vmul.f32 0.5, %v980_v6 }
 0x14d   : > { %v705_v11 = vadd.f32 0.5, %v701_v9 }
 0x14f   : > { %v709_v13 = vmul.f32 %v705_v11, %v689_v2 }
 0x151   : > { %v711_v14 = vpack.c.bf16 %v709_v13, %v708_v12 }
 0x153   : > { %911 = vmatmul.msk.bf16.gmra.mxu2 %vm439_vm0, %v711_v14 }
 0x1c1   : > { %v747_v8 = vpop.f32.mrf.mxu2 }
 0x1c2   : > { %v748_v16 = vadd.f32 %v964_v15, %v747_v8 }
 0x1c4   : > { %v757_v17 = vmul.f32 0.5, %v748_v16 }
 0x1c6   : > { %981 = vtanh.f32 %v757_v17 }
 0x1c9   : > { %v749_v18 = vpop.f32.mrf.mxu2 }
 0x1ca   : > { %v750_v19 = vadd.f32 %v964_v15, %v749_v18 }
 0x1cc   : > { %v982_v20 = vpop.eup %981  ;;  %v758_v21 = vmul.f32 0.5, %v750_v19 }
 0x1cd   : > { %v765_v10 = vmul.f32 0.5, %v982_v20 }
 0x1ce   : > { %983 = vtanh.f32 %v758_v21 }
 0x1cf   : > { %v769_v22 = vadd.f32 0.5, %v765_v10 }
 0x1d1   : > { %v773_v23 = vmul.f32 %v769_v22, %v748_v16 }
 0x1d3   : > { %777 = vst.msk [vmem:[%s410_s16] sm:$0xff] %vm439_vm0, %v773_v23 }
 0x1d4   : > { %v984_v25 = vpop.eup %983 }
 0x1d5   : > { %v766_v27 = vmul.f32 0.5, %v984_v25 }
 0x1d6   : > { %v752_v24 = vpop.f32.mrf.mxu2 }
 0x1d7   : > { %v753_v26 = vadd.f32 %v964_v15, %v752_v24  ;;  %v770_v29 = vadd.f32 0.5, %v766_v27 }
 0x1d9   : > { %v759_v28 = vmul.f32 0.5, %v753_v26  ;;  %v774_v30 = vmul.f32 %v770_v29, %v750_v19 }
 0x1db   : > { %985 = vtanh.f32 %v759_v28  ;;  %778 = vst.msk [vmem:[%s410_s16 + $0x8] sm:$0xff] %vm439_vm0, %v774_v30 }
 0x1de   : > { %v754_v31 = vpop.f32.mrf.mxu2 }
 0x1df   : > { %v755_v32 = vadd.f32 %v964_v15, %v754_v31 }
 0x1e1   : > { %v986_v33 = vpop.eup %985  ;;  %v760_v34 = vmul.f32 0.5, %v755_v32 }
 0x1e2   : > { %v767_v35 = vmul.f32 0.5, %v986_v33 }
 0x1e3   : > { %987 = vtanh.f32 %v760_v34 }
 0x1e4   : > { %v771_v36 = vadd.f32 0.5, %v767_v35 }
 0x1e6   : > { %v775_v37 = vmul.f32 %v771_v36, %v753_v26 }
 0x1e8   : > { %779 = vst.msk [vmem:[%s410_s16 + $0x10] sm:$0xff] %vm439_vm0, %v775_v37 }
 0x1e9   : > { %v988_v38 = vpop.eup %987 }
 0x1ea   : > { %v768_v39 = vmul.f32 0.5, %v988_v38 }
 0x1ec   : > { %v772_v40 = vadd.f32 0.5, %v768_v39 }
 0x1ee   : > { %v776_v41 = vmul.f32 %v772_v40, %v755_v32 }
 0x1f0   : > { %780 = vst.msk [vmem:[%s410_s16 + $0x18] sm:$0xff] %vm439_vm0, %v776_v41 }
 0x1f1 PF: > { %s21_s17 = sadd.s32 1, %s995_s17  }
 0x1f2   : > { %p18_p4 = scmp.ge.s32.totalorder %s21_s17, 6  }
 0x1f4   :  { %20 = sbr.rel (!%p18_p4) target bundleno = 1 (0x1), region = 97 }

</bundles_post_ra>
